<compile_context>
chip_gen: v5e
topology: v5e:2x2
jax: 0.10.0
libtpu: 0.0.40
codegen_flags: <defaults>
</compile_context>

<pallas_src>
import functools
import math

import jax
import jax.numpy as jnp
from jax import lax
from jax.experimental import pallas as pl
from jax.experimental.pallas import tpu as pltpu

LANE = 128
LOG_1E4 = math.log(1e-4)  # log of the clamped "0" entries of the one-hot (< 0)


def _nrce_kernel(
    x_ref,          # (C, TR, 128) logits block (any float dtype)
    t_ref,          # (TR, 128) int32 targets block
    sum_ref,        # (1, 128) per-(batch, split) partial rce sums (output)
    cnt_ref,        # (1, 128) per-(batch, split) partial valid counts (output)
    acc_sum_ref,    # (TR, 128) f32 scratch accumulator
    acc_cnt_ref,    # (TR, 128) f32 scratch accumulator
    *,
    num_classes,
    ignore_index,
    hw_valid,
    tile_rows,
    tiles_inner,
    needs_pixel_mask,
):
    s_idx = pl.program_id(1)      # pixel-axis core split
    i = pl.program_id(2)          # pixel-tile index within this (batch, split)

    @pl.when(i == 0)
    def _():
        acc_sum_ref[...] = jnp.zeros_like(acc_sum_ref)
        acc_cnt_ref[...] = jnp.zeros_like(acc_cnt_ref)

    t = t_ref[...]                                            # (TR, 128) int32

    # ---- softmax over classes, unrolled over the small leading C axis ----
    xs = [x_ref[c].astype(jnp.float32) for c in range(num_classes)]
    m = xs[0]
    for c in range(1, num_classes):
        m = jnp.maximum(m, xs[c])
    es = [jnp.exp(x - m) for x in xs]
    ssum = es[0]
    for c in range(1, num_classes):
        ssum = ssum + es[c]
    inv_s = 1.0 / ssum

    # rce = -sum_c clip(p_c) * log(clip(one_hot_c, 1e-4, 1))
    #     = (-log(1e-4)) * sum_{c != target} max(p_c, 1e-7)
    # (target-class term is exactly zero since log(1.0) == 0; softmax output
    #  never exceeds 1, so the upper clamp of the reference is a no-op)
    acc = jnp.zeros_like(ssum)
    for c in range(num_classes):
        p_c = jnp.maximum(es[c] * inv_s, 1e-7)
        acc = acc + jnp.where(t == c, 0.0, p_c)
    rce = (-LOG_1E4) * acc                                    # (TR, 128)

    # ---- validity mask + accumulation ----
    valid = t != ignore_index

    def accumulate(v):
        acc_sum_ref[...] += jnp.where(v, rce, 0.0)
        acc_cnt_ref[...] += v.astype(jnp.float32)

    if needs_pixel_mask:
        # Only the tile(s) whose pixel range extends past H*W need the
        # iota-based mask (garbage re-reads from ragged/out-of-range blocks).
        tile_start = (s_idx * tiles_inner + i) * (tile_rows * LANE)
        overflows = tile_start + tile_rows * LANE > hw_valid

        @pl.when(overflows)
        def _():
            rows = lax.broadcasted_iota(jnp.int32, t.shape, 0)
            lanes = lax.broadcasted_iota(jnp.int32, t.shape, 1)
            pix = tile_start + rows * LANE + lanes
            accumulate(valid & (pix < hw_valid))

        @pl.when(jnp.logical_not(overflows))
        def _():
            accumulate(valid)
    else:
        accumulate(valid)

    @pl.when(i == pl.num_programs(2) - 1)
    def _():
        sum_ref[...] = jnp.sum(acc_sum_ref[...], axis=0, keepdims=True)
        cnt_ref[...] = jnp.sum(acc_cnt_ref[...], axis=0, keepdims=True)


def normalized_reverse_cross_entropy_loss(
    inputs, targets, *, num_classes=4, ignore_index=-100, reduction="mean",
    tile_pixels=262144, core_splits=2,
):
    """inputs: (B, C, H, W) float logits (f32 or bf16); targets: (B, H, W) int."""
    B, C, H, W = inputs.shape
    assert C == num_classes
    HW = H * W

    # Free views only on the common path: NCHW -> (B, C, HW) -> (B, C, P, 128).
    x = inputs.reshape(B, C, HW)
    # Pass int32 targets so this is a no-op (other int dtypes force a full
    # HBM conversion pass before a bandwidth-bound kernel).
    t = targets.reshape(B, HW).astype(jnp.int32)

    HW_pad = pl.cdiv(HW, LANE) * LANE
    if HW_pad != HW:
        # TODO(synk): this fallback materializes a full HBM copy of the logits
        # (~2x total traffic for a memory-bound kernel). Prefer H*W % 128 == 0
        # or pad upstream. Padded targets are ignore_index, so padded pixels
        # drop out of both the sum and the count.
        x = jnp.pad(x, ((0, 0), (0, 0), (0, HW_pad - HW)))
        t = jnp.pad(t, ((0, 0), (0, HW_pad - HW)), constant_values=ignore_index)

    P = HW_pad // LANE
    x = x.reshape(B, C, P, LANE)
    t = t.reshape(B, P, LANE)

    # Tile rows: either the full row extent (small images) or a multiple of 8
    # sized for ~tile_pixels pixels per grid step.
    max_tr = max(tile_pixels // LANE, 8)
    if P <= max_tr:
        TR = P
    else:
        TR = max_tr - (max_tr % 8)
    T = pl.cdiv(P, TR)            # pixel tiles per batch image

    # Split the pixel-tile axis into a second "parallel" grid axis so both
    # TensorCores on v7x stream HBM even when B == 1. Only applied when it
    # divides evenly (avoids fully out-of-range blocks); harmless/sequential
    # on single-core v5e/v6e.
    S = core_splits if (T >= core_splits and T % core_splits == 0) else 1
    T_inner = T // S

    # Pixel mask only needed when the grid's pixel coverage exceeds H*W
    # (ragged last tile). The HW->HW_pad region is already neutralized by the
    # ignore_index padding of the targets.
    needs_pixel_mask = (S * T_inner * TR * LANE) > HW

    kernel = functools.partial(
        _nrce_kernel,
        num_classes=C,
        ignore_index=ignore_index,
        hw_valid=HW,
        tile_rows=TR,
        tiles_inner=T_inner,
        needs_pixel_mask=needs_pixel_mask,
    )

    sum_p, cnt_p = pl.pallas_call(
        kernel,
        out_shape=(
            jax.ShapeDtypeStruct((B * S, 1, LANE), jnp.float32),
            jax.ShapeDtypeStruct((B * S, 1, LANE), jnp.float32),
        ),
        grid_spec=pltpu.PrefetchScalarGridSpec(
            num_scalar_prefetch=0,
            grid=(B, S, T_inner),
            in_specs=[
                pl.BlockSpec((pl.Squeezed(), C, TR, LANE),
                             lambda b, s, i: (b, 0, s * T_inner + i, 0)),
                pl.BlockSpec((pl.Squeezed(), TR, LANE),
                             lambda b, s, i: (b, s * T_inner + i, 0)),
            ],
            out_specs=[
                pl.BlockSpec((pl.Squeezed(), 1, LANE),
                             lambda b, s, i: (b * S + s, 0, 0)),
                pl.BlockSpec((pl.Squeezed(), 1, LANE),
                             lambda b, s, i: (b * S + s, 0, 0)),
            ],
            scratch_shapes=[
                pltpu.VMEM((TR, LANE), jnp.float32),
                pltpu.VMEM((TR, LANE), jnp.float32),
            ],
        ),
        compiler_params=pltpu.CompilerParams(
            # batch & pixel-split axes parallel -> both TensorCores on v7x;
            # inner pixel-tile axis carries the accumulator -> arbitrary.
            dimension_semantics=("parallel", "parallel", "arbitrary"),
            # TR=2048 working set (~12 MiB double-buffered) > v5e's 16 MiB
            # default scoped limit; 32 MiB is safe on v5e/v6e/v7x.
            vmem_limit_bytes=32 * 1024 * 1024,
        ),
    )(x, t)

    total_sum = jnp.sum(sum_p)
    total_cnt = jnp.sum(cnt_p)
    total_nrce = total_sum / (num_classes - 1) / 4.0
    if reduction == "mean":
        # Note: counting is f32 (exact below 2^24 valid pixels per reduction);
        # if every pixel is ignore_index this divides by zero (NaN), matching
        # the PyTorch module's behavior.
        return total_nrce / total_cnt
    elif reduction == "sum":
        return total_nrce
    else:
        # TODO(synk): reduction='none' returns a dynamically-sized vector of
        # per-valid-pixel losses (boolean compaction); no static-shape kernel.
        raise NotImplementedError(reduction)


def _reference(inputs, targets, *, num_classes=4, ignore_index=-100):
    # pure-JAX reference mirroring the PyTorch module
    B, C, H, W = inputs.shape
    pred = jax.nn.softmax(inputs.astype(jnp.float32), axis=1)
    pred = jnp.clip(pred, 1e-7, 1.0)
    pred = jnp.transpose(pred, (0, 2, 3, 1)).reshape(-1, C)
    t = targets.reshape(-1)
    valid = t != ignore_index
    oh = jax.nn.one_hot(jnp.where(valid, t, 0), num_classes)
    oh = jnp.clip(oh, 1e-4, 1.0)
    rce = -jnp.sum(pred * jnp.log(oh), axis=1)
    nrce = rce / (num_classes - 1) / 4.0
    nrce = jnp.where(valid, nrce, 0.0)
    return jnp.sum(nrce) / jnp.sum(valid.astype(jnp.float32))


if __name__ == "__main__":
    key = jax.random.PRNGKey(0)
    B, C, H, W = 2, 4, 16, 16
    k1, k2, k3 = jax.random.split(key, 3)

    inputs = jax.random.normal(k1, (B, C, H, W), dtype=jnp.float32)
    targets = jax.random.randint(k2, (B, H, W), 0, C, dtype=jnp.int32)
    # sprinkle some ignore_index pixels to exercise the valid mask
    drop = jax.random.bernoulli(k3, 0.1, (B, H, W))
    targets = jnp.where(drop, -100, targets)

    out = normalized_reverse_cross_entropy_loss(
        inputs, targets, num_classes=C, ignore_index=-100, reduction="mean"
    )
    out = jax.block_until_ready(out)

    ref = _reference(inputs, targets, num_classes=C, ignore_index=-100)
    assert jnp.allclose(out, ref, rtol=1e-5, atol=1e-5), (out, ref)

    print("KERNEL_OK")
</pallas_src>

<mosaic_0001>
module attributes {stable_mosaic.version = 11 : i64} {
  func.func @_nrce_kernel(%arg0: i32, %arg1: i32, %arg2: i32, %arg3: memref<1x4x2x128xf32, #tpu.memory_space<vmem>>, %arg4: memref<1x2x128xi32, #tpu.memory_space<vmem>>, %arg5: memref<1x1x128xf32, #tpu.memory_space<vmem>>, %arg6: memref<1x1x128xf32, #tpu.memory_space<vmem>>, %arg7: memref<2x128xf32, #tpu.memory_space<vmem>>, %arg8: memref<2x128xf32, #tpu.memory_space<vmem>>) attributes {dimension_semantics = [#tpu.dimension_semantics<parallel>, #tpu.dimension_semantics<parallel>, #tpu.dimension_semantics<arbitrary>], iteration_bounds = array<i64: 2, 1, 1>, scalar_prefetch = 0 : i64, scratch_operands = 2 : i64, tpu.core_type = #tpu.core_type<tc>, window_params = [{transform_indices = @transform_0, window_bounds = array<i64: 1, 4, 2, 128>}, {transform_indices = @transform_1, window_bounds = array<i64: 1, 2, 128>}, {transform_indices = @transform_2, window_bounds = array<i64: 1, 1, 128>}, {transform_indices = @transform_3, window_bounds = array<i64: 1, 1, 128>}]} {
    %c0_i32 = arith.constant 0 : i32
    %0 = arith.cmpi eq, %arg2, %c0_i32 : i32
    %1 = arith.extui %0 : i1 to i32
    %c0_i32_0 = arith.constant 0 : i32
    %2 = arith.cmpi ne, %1, %c0_i32_0 : i32
    scf.if %2 {
      %cst_38 = arith.constant 0.000000e+00 : f32
      %79 = vector.broadcast %cst_38 : f32 to vector<2x128xf32>
      %c0_39 = arith.constant 0 : index
      %c0_40 = arith.constant 0 : index
      %80 = vector.load %arg7[%c0_39, %c0_40] : memref<2x128xf32, #tpu.memory_space<vmem>>, vector<2x128xf32>
      tpu.vector_store %arg7[%c0_39, %c0_40], %79 {strides = array<i32>} : memref<2x128xf32, #tpu.memory_space<vmem>>, vector<2x128xf32>,
      %cst_41 = arith.constant 0.000000e+00 : f32
      %81 = vector.broadcast %cst_41 : f32 to vector<2x128xf32>
      %c0_42 = arith.constant 0 : index
      %c0_43 = arith.constant 0 : index
      %82 = vector.load %arg8[%c0_42, %c0_43] : memref<2x128xf32, #tpu.memory_space<vmem>>, vector<2x128xf32>
      tpu.vector_store %arg8[%c0_42, %c0_43], %81 {strides = array<i32>} : memref<2x128xf32, #tpu.memory_space<vmem>>, vector<2x128xf32>,
    } else {
    }
    %c0 = arith.constant 0 : index
    %c0_1 = arith.constant 0 : index
    %c0_2 = arith.constant 0 : index
    %3 = vector.load %arg4[%c0, %c0_1, %c0_2] : memref<1x2x128xi32, #tpu.memory_space<vmem>>, vector<1x2x128xi32>
    %4 = vector.shape_cast %3 : vector<1x2x128xi32> to vector<2x128xi32>
    %c0_3 = arith.constant 0 : index
    %c0_4 = arith.constant 0 : index
    %c0_5 = arith.constant 0 : index
    %c0_6 = arith.constant 0 : index
    %5 = vector.load %arg3[%c0_3, %c0_4, %c0_5, %c0_6] : memref<1x4x2x128xf32, #tpu.memory_space<vmem>>, vector<1x1x2x128xf32>
    %6 = vector.shape_cast %5 : vector<1x1x2x128xf32> to vector<2x128xf32>
    %c0_7 = arith.constant 0 : index
    %c1 = arith.constant 1 : index
    %c0_8 = arith.constant 0 : index
    %c0_9 = arith.constant 0 : index
    %7 = vector.load %arg3[%c0_7, %c1, %c0_8, %c0_9] : memref<1x4x2x128xf32, #tpu.memory_space<vmem>>, vector<1x1x2x128xf32>
    %8 = vector.shape_cast %7 : vector<1x1x2x128xf32> to vector<2x128xf32>
    %c0_10 = arith.constant 0 : index
    %c2 = arith.constant 2 : index
    %c0_11 = arith.constant 0 : index
    %c0_12 = arith.constant 0 : index
    %9 = vector.load %arg3[%c0_10, %c2, %c0_11, %c0_12] : memref<1x4x2x128xf32, #tpu.memory_space<vmem>>, vector<1x1x2x128xf32>
    %10 = vector.shape_cast %9 : vector<1x1x2x128xf32> to vector<2x128xf32>
    %c0_13 = arith.constant 0 : index
    %c3 = arith.constant 3 : index
    %c0_14 = arith.constant 0 : index
    %c0_15 = arith.constant 0 : index
    %11 = vector.load %arg3[%c0_13, %c3, %c0_14, %c0_15] : memref<1x4x2x128xf32, #tpu.memory_space<vmem>>, vector<1x1x2x128xf32>
    %12 = vector.shape_cast %11 : vector<1x1x2x128xf32> to vector<2x128xf32>
    %13 = arith.maximumf %6, %8 : vector<2x128xf32>
    %14 = arith.maximumf %13, %10 : vector<2x128xf32>
    %15 = arith.maximumf %14, %12 : vector<2x128xf32>
    %16 = arith.subf %6, %15 : vector<2x128xf32>
    %17 = math.exp %16 : vector<2x128xf32>
    %18 = arith.subf %8, %15 : vector<2x128xf32>
    %19 = math.exp %18 : vector<2x128xf32>
    %20 = arith.subf %10, %15 : vector<2x128xf32>
    %21 = math.exp %20 : vector<2x128xf32>
    %22 = arith.subf %12, %15 : vector<2x128xf32>
    %23 = math.exp %22 : vector<2x128xf32>
    %24 = arith.addf %17, %19 : vector<2x128xf32>
    %25 = arith.addf %24, %21 : vector<2x128xf32>
    %26 = arith.addf %25, %23 : vector<2x128xf32>
    %cst = arith.constant 1.000000e+00 : f32
    %27 = vector.broadcast %cst : f32 to vector<2x128xf32>
    %28 = arith.divf %27, %26 : vector<2x128xf32>
    %cst_16 = arith.constant 0.000000e+00 : f32
    %29 = vector.broadcast %cst_16 : f32 to vector<2x128xf32>
    %30 = arith.mulf %17, %28 : vector<2x128xf32>
    %cst_17 = arith.constant 1.000000e-07 : f32
    %31 = vector.broadcast %cst_17 : f32 to vector<2x128xf32>
    %32 = arith.maximumf %30, %31 : vector<2x128xf32>
    %c0_i32_18 = arith.constant 0 : i32
    %33 = vector.broadcast %c0_i32_18 : i32 to vector<2x128xi32>
    %34 = arith.cmpi eq, %4, %33 : vector<2x128xi32>
    %cst_19 = arith.constant 0.000000e+00 : f32
    %35 = vector.broadcast %cst_19 : f32 to vector<2x128xf32>
    %36 = arith.select %34, %35, %32 : vector<2x128xi1>, vector<2x128xf32>
    %37 = arith.addf %29, %36 : vector<2x128xf32>
    %38 = arith.mulf %19, %28 : vector<2x128xf32>
    %cst_20 = arith.constant 1.000000e-07 : f32
    %39 = vector.broadcast %cst_20 : f32 to vector<2x128xf32>
    %40 = arith.maximumf %38, %39 : vector<2x128xf32>
    %c1_i32 = arith.constant 1 : i32
    %41 = vector.broadcast %c1_i32 : i32 to vector<2x128xi32>
    %42 = arith.cmpi eq, %4, %41 : vector<2x128xi32>
    %cst_21 = arith.constant 0.000000e+00 : f32
    %43 = vector.broadcast %cst_21 : f32 to vector<2x128xf32>
    %44 = arith.select %42, %43, %40 : vector<2x128xi1>, vector<2x128xf32>
    %45 = arith.addf %37, %44 : vector<2x128xf32>
    %46 = arith.mulf %21, %28 : vector<2x128xf32>
    %cst_22 = arith.constant 1.000000e-07 : f32
    %47 = vector.broadcast %cst_22 : f32 to vector<2x128xf32>
    %48 = arith.maximumf %46, %47 : vector<2x128xf32>
    %c2_i32 = arith.constant 2 : i32
    %49 = vector.broadcast %c2_i32 : i32 to vector<2x128xi32>
    %50 = arith.cmpi eq, %4, %49 : vector<2x128xi32>
    %cst_23 = arith.constant 0.000000e+00 : f32
    %51 = vector.broadcast %cst_23 : f32 to vector<2x128xf32>
    %52 = arith.select %50, %51, %48 : vector<2x128xi1>, vector<2x128xf32>
    %53 = arith.addf %45, %52 : vector<2x128xf32>
    %54 = arith.mulf %23, %28 : vector<2x128xf32>
    %cst_24 = arith.constant 1.000000e-07 : f32
    %55 = vector.broadcast %cst_24 : f32 to vector<2x128xf32>
    %56 = arith.maximumf %54, %55 : vector<2x128xf32>
    %c3_i32 = arith.constant 3 : i32
    %57 = vector.broadcast %c3_i32 : i32 to vector<2x128xi32>
    %58 = arith.cmpi eq, %4, %57 : vector<2x128xi32>
    %cst_25 = arith.constant 0.000000e+00 : f32
    %59 = vector.broadcast %cst_25 : f32 to vector<2x128xf32>
    %60 = arith.select %58, %59, %56 : vector<2x128xi1>, vector<2x128xf32>
    %61 = arith.addf %53, %60 : vector<2x128xf32>
    %cst_26 = arith.constant 9.21034049 : f32
    %62 = vector.broadcast %cst_26 : f32 to vector<2x128xf32>
    %63 = arith.mulf %62, %61 : vector<2x128xf32>
    %c-100_i32 = arith.constant -100 : i32
    %64 = vector.broadcast %c-100_i32 : i32 to vector<2x128xi32>
    %65 = arith.cmpi ne, %4, %64 : vector<2x128xi32>
    %c0_27 = arith.constant 0 : index
    %c0_28 = arith.constant 0 : index
    %66 = vector.load %arg7[%c0_27, %c0_28] : memref<2x128xf32, #tpu.memory_space<vmem>>, vector<2x128xf32>
    %cst_29 = arith.constant 0.000000e+00 : f32
    %67 = vector.broadcast %cst_29 : f32 to vector<2x128xf32>
    %68 = arith.select %65, %63, %67 : vector<2x128xi1>, vector<2x128xf32>
    %69 = arith.addf %66, %68 : vector<2x128xf32>
    %c0_30 = arith.constant 0 : index
    %c0_31 = arith.constant 0 : index
    %70 = vector.load %arg7[%c0_30, %c0_31] : memref<2x128xf32, #tpu.memory_space<vmem>>, vector<2x128xf32>
    tpu.vector_store %arg7[%c0_30, %c0_31], %69 {strides = array<i32>} : memref<2x128xf32, #tpu.memory_space<vmem>>, vector<2x128xf32>,
    %c0_32 = arith.constant 0 : index
    %c0_33 = arith.constant 0 : index
    %71 = vector.load %arg8[%c0_32, %c0_33] : memref<2x128xf32, #tpu.memory_space<vmem>>, vector<2x128xf32>
    %72 = arith.extui %65 : vector<2x128xi1> to vector<2x128xi32>
    %73 = arith.sitofp %72 : vector<2x128xi32> to vector<2x128xf32>
    %74 = arith.addf %71, %73 : vector<2x128xf32>
    %c0_34 = arith.constant 0 : index
    %c0_35 = arith.constant 0 : index
    %75 = vector.load %arg8[%c0_34, %c0_35] : memref<2x128xf32, #tpu.memory_space<vmem>>, vector<2x128xf32>
    tpu.vector_store %arg8[%c0_34, %c0_35], %74 {strides = array<i32>} : memref<2x128xf32, #tpu.memory_space<vmem>>, vector<2x128xf32>,
    %c0_i32_36 = arith.constant 0 : i32
    %76 = arith.cmpi eq, %arg2, %c0_i32_36 : i32
    %77 = arith.extui %76 : i1 to i32
    %c0_i32_37 = arith.constant 0 : i32
    %78 = arith.cmpi ne, %77, %c0_i32_37 : i32
    scf.if %78 {
      %c0_38 = arith.constant 0 : index
      %c0_39 = arith.constant 0 : index
      %79 = vector.load %arg7[%c0_38, %c0_39] : memref<2x128xf32, #tpu.memory_space<vmem>>, vector<2x128xf32>
      %cst_40 = arith.constant dense<0.000000e+00> : vector<128xf32>
      %80 = vector.multi_reduction <add>, %79, %cst_40 [0] : vector<2x128xf32> to vector<128xf32>
      %81 = vector.shape_cast %80 : vector<128xf32> to vector<1x128xf32>
      %c0_41 = arith.constant 0 : index
      %c0_42 = arith.constant 0 : index
      %c0_43 = arith.constant 0 : index
      %82 = vector.load %arg5[%c0_41, %c0_42, %c0_43] : memref<1x1x128xf32, #tpu.memory_space<vmem>>, vector<1x1x128xf32>
      %83 = vector.shape_cast %82 : vector<1x1x128xf32> to vector<1x128xf32>
      %84 = vector.shape_cast %81 : vector<1x128xf32> to vector<1x1x128xf32>
      tpu.vector_store %arg5[%c0_41, %c0_42, %c0_43], %84 {strides = array<i32>} : memref<1x1x128xf32, #tpu.memory_space<vmem>>, vector<1x1x128xf32>,
      %c0_44 = arith.constant 0 : index
      %c0_45 = arith.constant 0 : index
      %85 = vector.load %arg8[%c0_44, %c0_45] : memref<2x128xf32, #tpu.memory_space<vmem>>, vector<2x128xf32>
      %cst_46 = arith.constant dense<0.000000e+00> : vector<128xf32>
      %86 = vector.multi_reduction <add>, %85, %cst_46 [0] : vector<2x128xf32> to vector<128xf32>
      %87 = vector.shape_cast %86 : vector<128xf32> to vector<1x128xf32>
      %c0_47 = arith.constant 0 : index
      %c0_48 = arith.constant 0 : index
      %c0_49 = arith.constant 0 : index
      %88 = vector.load %arg6[%c0_47, %c0_48, %c0_49] : memref<1x1x128xf32, #tpu.memory_space<vmem>>, vector<1x1x128xf32>
      %89 = vector.shape_cast %88 : vector<1x1x128xf32> to vector<1x128xf32>
      %90 = vector.shape_cast %87 : vector<1x128xf32> to vector<1x1x128xf32>
      tpu.vector_store %arg6[%c0_47, %c0_48, %c0_49], %90 {strides = array<i32>} : memref<1x1x128xf32, #tpu.memory_space<vmem>>, vector<1x1x128xf32>,
    } else {
    }
    return
  }
  func.func @transform_0(%arg0: i32, %arg1: i32, %arg2: i32) -> (i32, i32, i32, i32) {
    %c1_i32 = arith.constant 1 : i32
    %0 = arith.muli %arg1, %c1_i32 : i32
    %1 = arith.addi %0, %arg2 : i32
    %c0_i32 = arith.constant 0 : i32
    %c0_i32_0 = arith.constant 0 : i32
    %c0_i32_1 = arith.constant 0 : i32
    return %arg0, %c0_i32, %1, %c0_i32_0 : i32, i32, i32, i32
  }
  func.func @transform_1(%arg0: i32, %arg1: i32, %arg2: i32) -> (i32, i32, i32) {
    %c1_i32 = arith.constant 1 : i32
    %0 = arith.muli %arg1, %c1_i32 : i32
    %1 = arith.addi %0, %arg2 : i32
    %c0_i32 = arith.constant 0 : i32
    %c0_i32_0 = arith.constant 0 : i32
    return %arg0, %1, %c0_i32 : i32, i32, i32
  }
  func.func @transform_2(%arg0: i32, %arg1: i32, %arg2: i32) -> (i32, i32, i32) {
    %c1_i32 = arith.constant 1 : i32
    %0 = arith.muli %arg0, %c1_i32 : i32
    %1 = arith.addi %0, %arg1 : i32
    %c0_i32 = arith.constant 0 : i32
    %c0_i32_0 = arith.constant 0 : i32
    %c0_i32_1 = arith.constant 0 : i32
    return %1, %c0_i32, %c0_i32_0 : i32, i32, i32
  }
  func.func @transform_3(%arg0: i32, %arg1: i32, %arg2: i32) -> (i32, i32, i32) {
    %c1_i32 = arith.constant 1 : i32
    %0 = arith.muli %arg0, %c1_i32 : i32
    %1 = arith.addi %0, %arg1 : i32
    %c0_i32 = arith.constant 0 : i32
    %c0_i32_0 = arith.constant 0 : i32
    %c0_i32_1 = arith.constant 0 : i32
    return %1, %c0_i32, %c0_i32_0 : i32, i32, i32
  }
}

</mosaic_0001>

<bundles_post_ra>
// kernel: tpu_custom_call.1
= control target key start
LH: loop header
LB: loop body
LE: loop exit
PB: predicated region body
PF: predicated region fallthrough
CT: control target
= control target key end

     0   :  { %9 = vsyncpa [#allocation5], 0  ;;  %s1023_s0 = inlined_call_operand.hbm [shape: f32[2,4,2,128], index: 0, kind: input, shape index: {}]   ;;  %s1024_s1 = inlined_call_operand.hbm [shape: s32[2,2,128], index: 1, kind: input, shape index: {}]   ;;  %s1025_s2 = inlined_call_operand.hbm [shape: f32[2,1,128], index: 2, kind: output, shape index: {0}]   ;;  %s1026_s3 = inlined_call_operand.hbm [shape: f32[2,1,128], index: 3, kind: output, shape index: {1}]  }
   0x1   :  { %11 = vsyncpa [#allocation5 + $0x1], 0 }
   0x2   :  { %12 = vsyncpa [#allocation8], 0 }
   0x3   :  { %14 = vsyncpa [#allocation8 + $0x1], 0 }
   0x4   :  { %15 = vsyncpa [#allocation6], 0 }
   0x5   :  { %17 = vsyncpa [#allocation6 + $0x1], 0 }
   0x6   :  { %18 = vsyncpa [#allocation11], 0 }
   0x7   :  { %20 = vsyncpa [#allocation11 + $0x1], 0  ;;  %s852_s12 = smov 0   ;;  %s854_s13 = smov 0  }
   0x8   :  { %s856_s14 = smov 0   ;;  %s858_s15 = smov 0  }
   0x9   :  { %s860_s16 = smov 0   ;;  %s862_s17 = smov 0  }
   0xa LB: > { %s545_s18 = sadd.s32 4294967295, %s827_s17   ;;  %s546_s19 = sadd.s32 4294967294, %s827_s17   ;;  %s827_s17 = sphi %s862_s17, %s26_s17   ;;  %s823_s16 = sphi %s860_s16, %s1036_s16   ;;  %s819_s15 = sphi %s858_s15, %s1035_s15   ;;  %s815_s14 = sphi %s856_s14, %s1034_s14   ;;  %s811_s13 = sphi %s854_s13, %s1033_s13   ;;  %s807_s12 = sphi %s852_s12, %s1032_s12  }
   0xb   : > { %s45_s20 = sadd.s32 1, %s823_s16  ;;  %s56_s21 = sadd.s32 1, %s815_s14 }
   0xc   : > { %p47_p0 = scmp.ge.s32.totalorder %s45_s20, 2  ;;  %p63_p1 = scmp.ne.s32.totalorder %s815_s14, %s811_s13 }
   0xd   : > { %p64_p2 = scmp.eq.s32.totalorder %s827_s17, 0  ;;  %p69_p3 = scmp.ne.s32.totalorder %s811_s13, %s807_s12 }
   0xe   : > { %s1038_s20 = smov (%p47_p0, %s45_s20), 0  ;;  %p70_p5 = scmp.eq.s32.totalorder %s545_s18, 0 }
   0xf   : > { %p893_p4 = por %p64_p2, %p63_p1  ;;  %s51_s23 = ssub.s32 %s823_s16, %s1038_s20 }
  0x10   : > { %p125_p6 = scmp.eq.s32.totalorder %s545_s18, 1  ;;  %p54_p7 = scmp.eq.s32.totalorder %s51_s23, 0 }
  0x11   : > { %p899_p8 = por %p70_p5, %p69_p3  ;;  %p131_p10 = scmp.eq.s32.totalorder %s546_s19, 1 }
  0x12   : > { %p903_p9 = por %p125_p6, %p63_p1  ;;  %p548_p12 = scmp.ge.s32.totalorder %s827_s17, 2 }
  0x13   : > { %s908_s26 = scalar_select %p54_p7, %s815_s14, %s56_s21  }
  0x14   : > { %p910_p11 = por %p131_p10, %p69_p3  ;;  %p586_p13 = scmp.lt.s32.totalorder %s827_s17, 2 }
  0x15   : > { %s179_s28 = sand.u32 1, %s815_s14   ;;  %s563_s30 = sshll.u32 %s823_s16, 3 }
  0x16   : > { %s549_s29 = sshll.u32 %s179_s28, 3  ;;  %s190_s6 = scalar_lea.hbm %s1023_s0, %s563_s30 }
  0x17   : > { %s183_s7 = scalar_lea.vmem [#allocation4], %s549_s29  ;;  %s191_s9 = sshll.u32 %s190_s6, 4  ;;  %s192_s9 = int_to_ptr.hbm [resolvable:$true] %s191_s9 }
  0x18   : > { %s193_s8 = sshll.u32 %s183_s7, 4  ;;  %p923_p0 = pnand %p586_p13, %p893_p4  ;;  %s194_s8 = int_to_ptr.vmem [resolvable:$true] %s193_s8 }
  0x19   : > { %p554_p1 = scmp.ge.s32.totalorder %s827_s17, 1  ;;  %s180_s11 = scalar_lea.sflag [#allocation5], %s179_s28 }
  0x1a   : > { %s829_s18 = smov 32   ;;  %s830_s19 = smov 2  }
  0x1b   : > { %575 = dma.hbm_to_vmem [thread:$0]  (!%p923_p0), %s192_s9, 128, %s194_s8, %s180_s11, %s829_s18, %s829_s18, %s830_s19  }
  0x1c   : > { %p222_p2 = scmp.lt.s32.totalorder %s827_s17, 3  ;;  %s552_s21 = sshll.u32 %s179_s28, 1 }
  0x1d   : > { %s553_s23 = sshll.u32 %s823_s16, 1  ;;  %s207_s4 = scalar_lea.vmem [#allocation7], %s552_s21 }
  0x1e   : > { %p223_p3 = pnand %p554_p1, %p222_p2  ;;  %s213_s22 = scalar_lea.hbm %s1024_s1, %s553_s23 }
  0x1f   : > { %s217_s5 = sshll.u32 %s207_s4, 4  ;;  %s215_s6 = sshll.u32 %s213_s22, 4  ;;  %s218_s5 = int_to_ptr.vmem [resolvable:$true] %s217_s5  ;;  %s216_s6 = int_to_ptr.hbm [resolvable:$true] %s215_s6 }
  0x20   : > { %s204_s7 = scalar_lea.sflag [#allocation8], %s179_s28  ;;  %226 = sbr.rel (%p223_p3) target bundleno = 125 (0x7d), region = 28 }
  0x21   : > { %578 = dma.hbm_to_vmem [thread:$0]  (!%p923_p0), %s216_s6, 32, %s218_s5, %s204_s7  }
  0x22   : > { %s938_s8 = sand.u32 (!%p223_p3), 1, %s811_s13  }
  0x23   : > { %s555_s9 = sshll.u32 (!%p223_p3), %s938_s8, 3  ;;  %s229_s11 = scalar_lea.sflag (!%p223_p3), [#allocation5], %s938_s8 }
  0x24   : > { %s232_s18 = scalar_lea.vmem (!%p223_p3), [#allocation4], %s555_s9 }
  0x25   : > { %790 = dma.done.wait (%p899_p8), %s229_s11, 128  }
  0x26   : > { %792 = vsyncadd (%p899_p8), %s229_s11, 4294967168  ;;  %s556_s28 = sshll.u32 %s938_s8, 1  ;;  %s239_s10 = scalar_lea.sflag [#allocation8], %s938_s8 }
  0x27   : > { %s242_s19 = scalar_lea.vmem [#allocation7], %s556_s28 }
  0x28   : > { %794 = dma.done.wait (%p899_p8), %s239_s10, 32  }
  0x29   : > { %796 = vsyncadd (%p899_p8), %s239_s10, 4294967264  ;;  %v831_v0 = vmov 0.0   ;;  %v952_v1 = vld [vmem:[%s242_s19] sm:$0x3]  ;;  %v285_v2 = vld [vmem:[%s232_s18] sm:$0x3]  ;;  %s406_s23 = scalar_lea.hbm %s1026_s3, %s819_s15 }
  0x2a   : > { %283 = vst [vmem:[#allocation3] sm:$0x3] %v831_v0  ;;  %v557_v3 = vld [vmem:[%s232_s18 + $0x2] sm:$0x3]  ;;  %vm346_vm0 = vcmp.ne.s32.totalorder %v952_v1, 4294967196  ;;  %vm360_vm1 = vcmask 1041408  }
  0x2b   : > { %282 = vst [vmem:[#allocation2] sm:$0x3] %v831_v0  ;;  %v558_v5 = vld [vmem:[%s232_s18 + $0x4] sm:$0x3]  ;;  %v292_v6 = vmax.f32 %v285_v2, %v557_v3  ;;  %v560_v7 = vsel %vm346_vm0, 1.0, %v831_v0  ;;  %s273_s29 = scalar_lea.vmem [#allocation10], %s938_s8 }
  0x2c   : > { %v559_v8 = vld [vmem:[%s232_s18 + $0x6] sm:$0x3]  ;;  %s963_s30 = sshll.u32 %s273_s29, 4  ;;  %s410_s22 = sshll.u32 %s406_s23, 4  ;;  %s409_s30 = int_to_ptr.vmem [resolvable:$true] %s963_s30  ;;  %s411_s22 = int_to_ptr.hbm [resolvable:$true] %s410_s22 }
  0x2d   : > { %v293_v10 = vmax.f32 %v292_v6, %v558_v5  ;;  %s383_s4 = scalar_lea.sflag [#allocation11], %s938_s8  ;;  %s723_s5 = sshra.s32 %s411_s22, 4  ;;  %s724_s5 = int_to_ptr.hbm [resolvable:$true] %s723_s5 }
  0x2e   : > { %s725_s6 = scalar_lea.hbm %s724_s5, 1  ;;  %s729_s11 = scalar_lea.hbm %s1026_s3, 2 }
  0x2f   : > { %v294_v11 = vmax.f32 %v293_v10, %v559_v8  ;;  %p726_p4 = scmp.ne.s32.totalorder %s724_s5, %s725_s6  ;;  %p730_p7 = scmp.lt.s32.totalorder %s724_s5, %s1026_s3 }
  0x30   : > { %p731_p8 = scmp.lt.s32.totalorder %s729_s11, %s725_s6 }
  0x31   : > { %v351_v4 = vld [vmem:[#allocation3] sm:$0x3]  ;;  %v295_v12 = vsub.f32 %v285_v2, %v294_v11  ;;  %v298_v13 = vsub.f32 %v557_v3, %v294_v11  ;;  %v301_v14 = vsub.f32 %v558_v5, %v294_v11  ;;  %v304_v15 = vsub.f32 %v559_v8, %v294_v11  ;;  %p727_p5 = pnand %p726_p4, %p903_p9 }
  0x32   : > { %v354_v9 = vadd.f32 %v560_v7, %v351_v4  ;;  %p732_p10 = por %p731_p8, %p730_p7 }
  0x33   : > { %v296_v16 = vmul.f32 1.442695, %v295_v12  ;;  %v299_v17 = vmul.f32 1.442695, %v298_v13  ;;  %v302_v18 = vmul.f32 1.442695, %v301_v14  ;;  %p728_p6 = pneg %p727_p5 }
  0x34   : > { %355 = vst [vmem:[#allocation3] sm:$0x3] %v354_v9  ;;  %v305_v19 = vmul.f32 1.442695, %v304_v15 }
  0x35   : > { %639 = vpow2.f32 %v296_v16  ;;  %p733_p13 = pnand %p732_p10, %p728_p6 }
  0x36   : > { %641 = vpow2.f32 %v299_v17 }
  0x37   : > { %643 = vpow2.f32 %v302_v18 }
  0x38   : > { %645 = vpow2.f32 %v305_v19 }
  0x3b   : > { %v640_v20 = vpop.eup %639  ;;  %v369_v27 = vld [vmem:[#allocation3] sm:$0x3] }
  0x3c   : > { %v642_v21 = vpop.eup %641  ;;  %v370_v28 = vsel %vm360_vm1, %v369_v27, 0.0 }
  0x3d   : > { %v644_v22 = vpop.eup %643  ;;  %v307_v23 = vadd.f32 %v642_v21, %v640_v20  ;;  %v371_v29 = vrot.slane %v370_v28, 4 }
  0x3e   : > { %v646_v24 = vpop.eup %645 }
  0x3f   : > { %v308_v25 = vadd.f32 %v644_v22, %v307_v23  ;;  %v372_v30 = vadd.f32 %v371_v29, %v370_v28 }
  0x41   : > { %v309_v26 = vadd.f32 %v646_v24, %v308_v25  ;;  %v373_v33 = vrot.slane %v372_v30, 2 }
  0x43   : > { %647 = vrcp.f32 %v309_v26  ;;  %vm315_vm2 = vweird.f32 %v309_v26  ;;  %v321_v34 = vand.u32 2147483648, %v309_v26  ;;  %v319_v36 = vand.u32 2147483647, %v309_v26 }
  0x44   : > { %v374_v37 = vadd.f32 %v373_v33, %v372_v30 }
  0x45   : > { %v322_v40 = vor.u32 1.1754944e-38, %v321_v34  ;;  %vm320_vm5 = vcmp.eq.f32.partialorder %v319_v36, 8.507059e+37 }
  0x46   : > { %v375_v39 = vrot.slane %v374_v37, 1 }
  0x48   : > { %v376_v42 = vadd.f32 %v375_v39, %v374_v37 }
  0x49   : > { %v648_v31 = vpop.eup %647 }
  0x4a   : > { %v311_v32 = vmul.f32 %v648_v31, %v309_v26  ;;  %vm316_vm3 = vweird.f32 %v648_v31  ;;  %377 = vst [vmem:[%s273_s29] sm:$0x1] %v376_v42 }
  0x4b   : > { %vm317_vm4 = vmor %vm315_vm2, %vm316_vm3 }
  0x4c   : > { %v312_v35 = vsub.f32 1.0, %v311_v32 }
  0x4e   : > { %v313_v38 = vmul.f32 %v648_v31, %v312_v35 }
  0x50   : > { %v314_v41 = vadd.f32 %v648_v31, %v313_v38 }
  0x52   : > { %v318_v43 = vsel %vm317_vm4, %v648_v31, %v314_v41 }
  0x53   : > { %v323_v44 = vsel %vm320_vm5, %v322_v40, %v318_v43 }
  0x54   : > { %736 = shalt.err (!%p733_p13)
}
  0x55   : > { %569 = dma.vmem_to_hbm [thread:$0]  (%p903_p9), %s409_s30, 16, %s411_s22, %s383_s4   ;;  %v325_v45 = vmul.f32 %v640_v20, %v323_v44  ;;  %v330_v46 = vmul.f32 %v642_v21, %v323_v44  ;;  %v335_v47 = vmul.f32 %v644_v22, %v323_v44  ;;  %v340_v48 = vmul.f32 %v646_v24, %v323_v44  ;;  %v347_v61 = vld [vmem:[#allocation2] sm:$0x3] }
  0x56   : > { %vm327_vm6 = vcmp.eq.s32.totalorder %v952_v1, 0  ;;  %vm332_vm7 = vcmp.eq.s32.totalorder %v952_v1, 1  ;;  %vm337_vm8 = vcmp.eq.s32.totalorder %v952_v1, 2  ;;  %vm342_vm9 = vcmp.eq.s32.totalorder %v952_v1, 3  ;;  %s392_s24 = scalar_lea.hbm %s1025_s2, %s819_s15  ;;  %s267_s21 = scalar_lea.vmem [#allocation9], %s938_s8 }
  0x57   : > { %v326_v49 = vmax.f32 %v325_v45, 1e-07  ;;  %v331_v50 = vmax.f32 %v330_v46, 1e-07  ;;  %v336_v51 = vmax.f32 %v335_v47, 1e-07 }
  0x58   : > { %v341_v52 = vmax.f32 %v340_v48, 1e-07  ;;  %s394_s23 = sshll.u32 %s267_s21, 4  ;;  %s396_s29 = sshll.u32 %s392_s24, 4  ;;  %s395_s23 = int_to_ptr.vmem [resolvable:$true] %s394_s23  ;;  %s397_s29 = int_to_ptr.hbm [resolvable:$true] %s396_s29 }
  0x59   : > { %v328_v53 = vsel %vm327_vm6, 0.0, %v326_v49  ;;  %v333_v54 = vsel %vm332_vm7, 0.0, %v331_v50  ;;  %v338_v55 = vsel %vm337_vm8, 0.0, %v336_v51  ;;  %s379_s30 = scalar_lea.sflag [#allocation6], %s938_s8  ;;  %s751_s22 = sshra.s32 %s397_s29, 4  ;;  %s752_s22 = int_to_ptr.hbm [resolvable:$true] %s751_s22 }
  0x5a   : > { %v334_v56 = vadd.f32 %v333_v54, %v328_v53  ;;  %v343_v57 = vsel %vm342_vm9, 0.0, %v341_v52  ;;  %s753_s4 = scalar_lea.hbm %s752_s22, 1  ;;  %s757_s15 = scalar_lea.hbm %s1025_s2, 2 }
  0x5b   : > { %p754_p0 = scmp.ne.s32.totalorder %s752_s22, %s753_s4  ;;  %p758_p3 = scmp.lt.s32.totalorder %s752_s22, %s1025_s2 }
  0x5c   : > { %v339_v58 = vadd.f32 %v338_v55, %v334_v56  ;;  %p759_p4 = scmp.lt.s32.totalorder %s757_s15, %s753_s4 }
  0x5d   : > { %p755_p1 = pnand %p754_p0, %p903_p9 }
  0x5e   : > { %v344_v59 = vadd.f32 %v343_v57, %v339_v58  ;;  %p760_p5 = por %p759_p4, %p758_p3 }
  0x5f   : > { %p756_p2 = pneg %p755_p1 }
  0x60   : > { %v345_v60 = vmul.f32 9.2103405, %v344_v59 }
  0x61   : > { %p761_p6 = pnand %p760_p5, %p756_p2 }
  0x62   : > { %v348_v62 = vsel %vm346_vm0, %v345_v60, 0.0 }
  0x63   : > { %v349_v63 = vadd.f32 %v348_v62, %v347_v61 }
  0x65   : > { %350 = vst [vmem:[#allocation2] sm:$0x3] %v349_v63 }
  0x6c   : > { %v359_v0 = vld [vmem:[#allocation2] sm:$0x3] }
  0x6d   : > { %v361_v2 = vsel %vm360_vm1, %v359_v0, 0.0 }
  0x6e   : > { %v362_v3 = vrot.slane %v361_v2, 4 }
  0x70   : > { %v363_v4 = vadd.f32 %v362_v3, %v361_v2 }
  0x72   : > { %v364_v5 = vrot.slane %v363_v4, 2 }
  0x74   : > { %v365_v6 = vadd.f32 %v364_v5, %v363_v4 }
  0x76   : > { %v366_v1 = vrot.slane %v365_v6, 1 }
  0x78   : > { %v367_v7 = vadd.f32 %v366_v1, %v365_v6 }
  0x7a   : > { %368 = vst [vmem:[%s267_s21] sm:$0x1] %v367_v7 }
  0x7b   : > { %764 = shalt.err (!%p761_p6)
}
  0x7c   : > { %568 = dma.vmem_to_hbm [thread:$0]  (%p903_p9), %s395_s23, 16, %s397_s29, %s379_s30  }
  0x7d PF: > { %s422_s8 = sand.u32 1, %s807_s12   ;;  %p580_p7 = pnand %p548_p12, %p910_p11 }
  0x7e   : > { %s423_s11 = scalar_lea.sflag [#allocation6], %s422_s8 }
  0x7f   : > { %p581_p8 = pneg %p580_p7 }
  0x81   : > { %798 = dma.done.wait (%p581_p8), %s423_s11, 16  }
  0x82   : > { %800 = vsyncadd (%p581_p8), %s423_s11, 4294967280  ;;  %s432_s18 = scalar_lea.sflag [#allocation11], %s422_s8 }
  0x83   : > { %802 = dma.done.wait (%p581_p8), %s432_s18, 16  }
  0x84   : > { %804 = vsyncadd (%p581_p8), %s432_s18, 4294967280  ;;  %s26_s17 = sadd.s32 1, %s827_s17   ;;  %s1032_s12 = smov %s811_s13 }
  0x85   : > { %p23_p10 = scmp.ge.s32.totalorder %s26_s17, 4   ;;  %s1033_s13 = smov %s815_s14 }
  0x86   : > { %s1034_s14 = smov %s908_s26  ;;  %s1035_s15 = smov %s823_s16 }
  0x87   : > { %s1036_s16 = smov %s1038_s20  ;;  %25 = sbr.rel (!%p23_p10) target bundleno = 10 (0xa), region = 114 }
  0x8c   :  { %437 = vsyncpa [#allocation5], 1 }
  0x8d   :  { %439 = vsyncpa [#allocation5 + $0x1], 1 }
  0x8e   :  { %440 = vsyncpa [#allocation8], 1 }
  0x8f   :  { %442 = vsyncpa [#allocation8 + $0x1], 1 }
  0x90   :  { %443 = vsyncpa [#allocation6], 1 }
  0x91   :  { %445 = vsyncpa [#allocation6 + $0x1], 1 }
  0x92   :  { %446 = vsyncpa [#allocation11], 1 }
  0x93   :  { %448 = vsyncpa [#allocation11 + $0x1], 1 }

</bundles_post_ra>
